<compile_context>
chip_gen: v5e
topology: v5e:2x2
jax: 0.10.0
libtpu: 0.0.40
codegen_flags: <defaults>
</compile_context>

<pallas_src>
import functools

import jax
import jax.numpy as jnp
from jax import lax
from jax.experimental import pallas as pl
from jax.experimental.pallas import tpu as pltpu


# ------------------------------ helpers ------------------------------------ #
def _round_up(x, m):
    return ((x + m - 1) // m) * m


def _vmem_capacity_bytes():
    """Physical per-core VMEM; falls back to the smallest (v7x: 64 MiB)."""
    try:
        info = pltpu.get_tpu_info()
        for attr in ("vmem_capacity_bytes", "vmem_size_bytes", "vmem_bytes"):
            v = getattr(info, attr, None)
            if v:
                return int(v)
    except Exception:
        pass
    return 64 * 1024 * 1024


def _tile_vmem_bytes(Cq, Cout, KK, FLAT, Wq, tho, in_esize, out_esize):
    """Working-set estimate for one grid step (with sublane/lane padding)."""
    L = tho * Wq
    img = _round_up(Cq, 8) * _round_up(FLAT, 128) * in_esize
    wgt = _round_up(Cout, 8) * _round_up(KK * Cq, 128) * in_esize
    bias = 8 * 128 * 4
    patch = _round_up(KK * Cq, 8) * _round_up(L, 128) * in_esize   # scratch
    acc = _round_up(Cout, 8) * _round_up(L, 128) * 4               # f32 result
    outb = _round_up(Cout, 8) * _round_up(L, 128) * out_esize
    # Pipelined operands are double-buffered; patch/acc live once.
    return 2 * (img + wgt + bias + outb) + patch + acc + (2 << 20)


def _pick_row_tile(Ho, Wq, fits):
    """Largest divisor of Ho whose tile fits VMEM; prefer lane widths that are
    multiples of 128 (unmasked stores; 128-aligned dynamic slice bases)."""
    divisors = [d for d in range(1, Ho + 1) if Ho % d == 0]
    feasible = [d for d in divisors if fits(d)]
    if not feasible:
        # TODO(synk): very large images need a halo-DMA row-window scheme
        # (memory_space=pl.ANY + make_async_copy) instead of a resident image.
        return 1
    aligned = [d for d in feasible if d == Ho or (d * Wq) % 128 == 0]
    return max(aligned) if aligned else max(feasible)


# ------------------------------ kernel -------------------------------------- #
def _make_kernel(Cq, Cout, Kq, Wq, tho, num_row_tiles):
    KK = Kq * Kq
    L = tho * Wq

    def kernel(x_ref, w_ref, b_ref, o_ref, patch_ref):
        # x_ref:     (Cq, FLAT)    resident flattened (phase-decomposed) image
        # w_ref:     (Cout, KK*Cq) fused weights, tap-major / channel-minor
        # b_ref:     (Cout, 1)     f32
        # o_ref:     (Cout, L)     output row tile (Wq lanes/row, first Wo valid)
        # patch_ref: (KK*Cq, L)    VMEM scratch for the fused im2col operand
        if num_row_tiles == 1:
            row0 = 0                                         # fully static slicing
        else:
            row0 = pl.multiple_of(pl.program_id(1) * tho, tho)

        # Fused im2col: each tap is ONE contiguous lane slice (spatial stays on
        # lanes, channels on sublanes) written straight into the patch scratch
        # -- no reshape, no relayout, no strided gathers.
        for qi in range(Kq):
            for qj in range(Kq):
                t = qi * Kq + qj
                start = (row0 + qi) * Wq + qj
                patch_ref[pl.ds(t * Cq, Cq), :] = x_ref[:, pl.ds(start, L)]

        # Single MXU contraction over the full Kq*Kq*Cq depth.
        acc = jnp.dot(w_ref[...], patch_ref[...],
                      preferred_element_type=jnp.float32)
        o_ref[...] = (acc + b_ref[...]).astype(o_ref.dtype)

    return kernel


# ------------------------------ wrapper ------------------------------------- #
def conv_layer_forward(x, weight, bias, kernel_size, stride,
                       compute_dtype=None, out_dtype=None):
    """ReflectionPad2d(kernel_size//2) + Conv2d(kernel_size, stride) forward.

    x: (N, C, H, W); weight: (Cout, C, K, K); bias: (Cout,).  Returns NCHW.
    """
    N, C, H, W = x.shape
    Cout = weight.shape[0]
    K = int(kernel_size)
    s = int(stride)
    if K % 2 == 0:
        raise NotImplementedError(
            "pad = K//2 with ReflectionPad2d matches the PyTorch module only "
            "for odd kernel_size")
    compute_dtype = x.dtype if compute_dtype is None else compute_dtype
    out_dtype = x.dtype if out_dtype is None else out_dtype

    pad = K // 2
    Hp, Wp = H + 2 * pad, W + 2 * pad
    Ho = (Hp - K) // s + 1
    Wo = (Wp - K) // s + 1

    # ---- stride-s -> stride-1 space-to-depth phase decomposition ----------- #
    #   x_ph[n, (c,pi,pj), ii, jj]  = x_pad[n, c, ii*s + pi, jj*s + pj]
    #   w_ph[co, (c,pi,pj), qi, qj] = w[co, c, qi*s + pi, qj*s + pj] (0 outside)
    # so the conv becomes a stride-1, Kq x Kq conv over Cq = C*s*s channels and
    # the kernel only ever does contiguous (unit-stride) loads.
    Kq = -(-K // s)                       # ceil(K / s)
    Cq = C * s * s
    Hq = Ho + Kq - 1                      # phase rows addressed by valid outputs
    Wq = Wo + Kq - 1
    Hq_alloc = Hq + 1                     # +1 guard row: wrap lanes stay in-bounds

    if s == 1:
        # Single pad pass (reflection + one extra bottom guard row whose
        # contents only feed garbage lanes).  No transpose pass is needed.
        # TODO(synk): fuse this pad into the kernel (in-VMEM border fill) to
        # drop the remaining extra HBM pass on the input.
        if H > pad + 1:
            x_ph = jnp.pad(x, ((0, 0), (0, 0), (pad, pad + 1), (pad, pad)),
                           mode="reflect")
        else:  # tiny-H fallback
            x_ph = jnp.pad(x, ((0, 0), (0, 0), (pad, pad), (pad, pad)),
                           mode="reflect")
            x_ph = jnp.pad(x_ph, ((0, 0), (0, 0), (0, 1), (0, 0)))
        # Here (Hq, Wq) == (Hp, Wp).
    else:
        xp = jnp.pad(x, ((0, 0), (0, 0), (pad, pad), (pad, pad)),
                     mode="reflect")
        Hs, Ws = Hq_alloc * s, Wq * s
        xp = xp[:, :, :Hs, :Ws]
        xp = jnp.pad(xp, ((0, 0), (0, 0),
                          (0, Hs - xp.shape[2]), (0, Ws - xp.shape[3])))
        x_ph = (xp.reshape(N, C, Hq_alloc, s, Wq, s)
                  .transpose(0, 1, 3, 5, 2, 4)
                  .reshape(N, Cq, Hq_alloc, Wq))

    FLAT = Hq_alloc * Wq
    x_flat = x_ph.reshape(N, Cq, FLAT).astype(compute_dtype)   # free reshape

    # Fused weights: (Cout, Kq, Kq, Cq) tap-major / channel-minor.
    if s == 1:
        w_ph = weight                                           # (Cout, C, K, K)
    else:
        wpad = jnp.pad(weight,
                       ((0, 0), (0, 0), (0, Kq * s - K), (0, Kq * s - K)))
        w_ph = (wpad.reshape(Cout, C, Kq, s, Kq, s)
                    .transpose(0, 1, 3, 5, 2, 4)
                    .reshape(Cout, Cq, Kq, Kq))
    KK = Kq * Kq
    w_fused = (w_ph.transpose(0, 2, 3, 1)
                   .reshape(Cout, KK * Cq)
                   .astype(compute_dtype))
    b_col = bias.reshape(Cout, 1).astype(jnp.float32)

    # ---- tile selection: largest row tile that fits the VMEM budget -------- #
    in_esize = jnp.dtype(compute_dtype).itemsize
    out_esize = jnp.dtype(out_dtype).itemsize
    vmem_cap = _vmem_capacity_bytes()
    budget = min(int(vmem_cap * 0.55), 100 * 1024 * 1024)
    fits = lambda d: _tile_vmem_bytes(Cq, Cout, KK, FLAT, Wq, d,
                                      in_esize, out_esize) <= budget
    tho = _pick_row_tile(Ho, Wq, fits)
    R = Ho // tho
    L = tho * Wq
    est = _tile_vmem_bytes(Cq, Cout, KK, FLAT, Wq, tho, in_esize, out_esize)
    vmem_limit = int(min(vmem_cap * 0.9, max(2 * est, 32 * 1024 * 1024)))

    kernel = _make_kernel(Cq, Cout, Kq, Wq, tho, R)

    out_flat = pl.pallas_call(
        kernel,
        out_shape=jax.ShapeDtypeStruct((N, Cout, Ho * Wq), out_dtype),
        grid_spec=pltpu.PrefetchScalarGridSpec(
            num_scalar_prefetch=0,
            grid=(N, R),
            in_specs=[
                # Whole flattened image per n; block index is constant across r
                # so it is fetched once per image and stays resident.
                pl.BlockSpec((None, Cq, FLAT), lambda n, r: (n, 0, 0)),
                pl.BlockSpec((Cout, KK * Cq), lambda n, r: (0, 0)),
                pl.BlockSpec((Cout, 1), lambda n, r: (0, 0)),
            ],
            out_specs=pl.BlockSpec((None, Cout, L), lambda n, r: (n, 0, r)),
            scratch_shapes=[pltpu.VMEM((KK * Cq, L), compute_dtype)],
        ),
        compiler_params=pltpu.CompilerParams(
            # When N > 1, keep the row axis "arbitrary" so a v7x megacore split
            # lands on the batch axis and does not duplicate the image DMA.
            dimension_semantics=("parallel",
                                 "arbitrary" if N > 1 else "parallel"),
            vmem_limit_bytes=vmem_limit,
        ),
    )(x_flat, w_fused, b_col)

    # (N, Cout, Ho*Wq) -> (N, Cout, Ho, Wq); drop the Kq-1 garbage columns.
    out = out_flat.reshape(N, Cout, Ho, Wq)
    if Wq != Wo:
        out = out[:, :, :, :Wo]
    return out


# ------------------------------- driver ------------------------------------- #
if __name__ == "__main__":
    base_key = jax.random.PRNGKey(0)

    def run_case(Cin, Cout_, K, s, N, H, W, tol):
        kx, kw, kb = jax.random.split(jax.random.fold_in(base_key, 100 * K + s), 3)
        x = jax.random.normal(kx, (N, Cin, H, W), dtype=jnp.float32)
        fan_in = Cin * K * K
        w = jax.random.normal(kw, (Cout_, Cin, K, K), dtype=jnp.float32)
        w = w * (1.0 / jnp.sqrt(fan_in))
        b = jax.random.normal(kb, (Cout_,), dtype=jnp.float32) * 0.1

        fwd = jax.jit(functools.partial(conv_layer_forward,
                                        kernel_size=K, stride=s))
        out = jax.block_until_ready(fwd(x, w, b))

        pad = K // 2
        xp = jnp.pad(x, ((0, 0), (0, 0), (pad, pad), (pad, pad)), mode="reflect")
        ref = lax.conv_general_dilated(
            xp, w, window_strides=(s, s), padding="VALID",
            dimension_numbers=("NCHW", "OIHW", "NCHW")) + b[None, :, None, None]

        assert out.shape == ref.shape, (out.shape, ref.shape)
        max_err = float(jnp.max(jnp.abs(out - ref)))
        assert jnp.allclose(out, ref, atol=tol, rtol=tol), max_err

    # ConvLayer(4, 8, kernel_size=3, stride=1) on (2, 4, 16, 16)
    run_case(4, 8, 3, 1, 2, 16, 16, 2e-2)
    # ConvLayer(4, 8, kernel_size=3, stride=2) on (2, 4, 16, 16)
    run_case(4, 8, 3, 2, 2, 16, 16, 2e-2)

    print("KERNEL_OK")
</pallas_src>

<mosaic_0001>
module attributes {stable_mosaic.version = 11 : i64} {
  func.func @kernel(%arg0: i32, %arg1: i32, %arg2: memref<1x4x342xf32, #tpu.memory_space<vmem>>, %arg3: memref<8x36xf32, #tpu.memory_space<vmem>>, %arg4: memref<8x1xf32, #tpu.memory_space<vmem>>, %arg5: memref<1x8x288xf32, #tpu.memory_space<vmem>>, %arg6: memref<36x288xf32, #tpu.memory_space<vmem>>) attributes {dimension_semantics = [#tpu.dimension_semantics<parallel>, #tpu.dimension_semantics<arbitrary>], iteration_bounds = array<i64: 2, 1>, scalar_prefetch = 0 : i64, scratch_operands = 1 : i64, tpu.core_type = #tpu.core_type<tc>, window_params = [{transform_indices = @transform_0, window_bounds = array<i64: 1, 4, 342>}, {pipeline_mode = #tpu.pipeline_mode<synchronous>, transform_indices = @transform_1, window_bounds = array<i64: 8, 36>}, {pipeline_mode = #tpu.pipeline_mode<synchronous>, transform_indices = @transform_2, window_bounds = array<i64: 8, 1>}, {transform_indices = @transform_3, window_bounds = array<i64: 1, 8, 288>}]} {
    %c0 = arith.constant 0 : index
    %c0_0 = arith.constant 0 : index
    %c0_1 = arith.constant 0 : index
    %0 = vector.load %arg2[%c0, %c0_0, %c0_1] : memref<1x4x342xf32, #tpu.memory_space<vmem>>, vector<1x4x288xf32>
    %1 = vector.shape_cast %0 : vector<1x4x288xf32> to vector<4x288xf32>
    %c0_2 = arith.constant 0 : index
    %c0_3 = arith.constant 0 : index
    %2 = vector.load %arg6[%c0_2, %c0_3] : memref<36x288xf32, #tpu.memory_space<vmem>>, vector<4x288xf32>
    tpu.vector_store %arg6[%c0_2, %c0_3], %1 {strides = array<i32>} : memref<36x288xf32, #tpu.memory_space<vmem>>, vector<4x288xf32>,
    %c0_4 = arith.constant 0 : index
    %c0_5 = arith.constant 0 : index
    %c1 = arith.constant 1 : index
    %3 = vector.load %arg2[%c0_4, %c0_5, %c1] : memref<1x4x342xf32, #tpu.memory_space<vmem>>, vector<1x4x288xf32>
    %4 = vector.shape_cast %3 : vector<1x4x288xf32> to vector<4x288xf32>
    %c4 = arith.constant 4 : index
    %c0_6 = arith.constant 0 : index
    %5 = vector.load %arg6[%c4, %c0_6] : memref<36x288xf32, #tpu.memory_space<vmem>>, vector<4x288xf32>
    tpu.vector_store %arg6[%c4, %c0_6], %4 {strides = array<i32>} : memref<36x288xf32, #tpu.memory_space<vmem>>, vector<4x288xf32>,
    %c0_7 = arith.constant 0 : index
    %c0_8 = arith.constant 0 : index
    %c2 = arith.constant 2 : index
    %6 = vector.load %arg2[%c0_7, %c0_8, %c2] : memref<1x4x342xf32, #tpu.memory_space<vmem>>, vector<1x4x288xf32>
    %7 = vector.shape_cast %6 : vector<1x4x288xf32> to vector<4x288xf32>
    %c8 = arith.constant 8 : index
    %c0_9 = arith.constant 0 : index
    %8 = vector.load %arg6[%c8, %c0_9] : memref<36x288xf32, #tpu.memory_space<vmem>>, vector<4x288xf32>
    tpu.vector_store %arg6[%c8, %c0_9], %7 {strides = array<i32>} : memref<36x288xf32, #tpu.memory_space<vmem>>, vector<4x288xf32>,
    %c0_10 = arith.constant 0 : index
    %c0_11 = arith.constant 0 : index
    %c18 = arith.constant 18 : index
    %9 = vector.load %arg2[%c0_10, %c0_11, %c18] : memref<1x4x342xf32, #tpu.memory_space<vmem>>, vector<1x4x288xf32>
    %10 = vector.shape_cast %9 : vector<1x4x288xf32> to vector<4x288xf32>
    %c12 = arith.constant 12 : index
    %c0_12 = arith.constant 0 : index
    %11 = vector.load %arg6[%c12, %c0_12] : memref<36x288xf32, #tpu.memory_space<vmem>>, vector<4x288xf32>
    tpu.vector_store %arg6[%c12, %c0_12], %10 {strides = array<i32>} : memref<36x288xf32, #tpu.memory_space<vmem>>, vector<4x288xf32>,
    %c0_13 = arith.constant 0 : index
    %c0_14 = arith.constant 0 : index
    %c19 = arith.constant 19 : index
    %12 = vector.load %arg2[%c0_13, %c0_14, %c19] : memref<1x4x342xf32, #tpu.memory_space<vmem>>, vector<1x4x288xf32>
    %13 = vector.shape_cast %12 : vector<1x4x288xf32> to vector<4x288xf32>
    %c16 = arith.constant 16 : index
    %c0_15 = arith.constant 0 : index
    %14 = vector.load %arg6[%c16, %c0_15] : memref<36x288xf32, #tpu.memory_space<vmem>>, vector<4x288xf32>
    tpu.vector_store %arg6[%c16, %c0_15], %13 {strides = array<i32>} : memref<36x288xf32, #tpu.memory_space<vmem>>, vector<4x288xf32>,
    %c0_16 = arith.constant 0 : index
    %c0_17 = arith.constant 0 : index
    %c20 = arith.constant 20 : index
    %15 = vector.load %arg2[%c0_16, %c0_17, %c20] : memref<1x4x342xf32, #tpu.memory_space<vmem>>, vector<1x4x288xf32>
    %16 = vector.shape_cast %15 : vector<1x4x288xf32> to vector<4x288xf32>
    %c20_18 = arith.constant 20 : index
    %c0_19 = arith.constant 0 : index
    %17 = vector.load %arg6[%c20_18, %c0_19] : memref<36x288xf32, #tpu.memory_space<vmem>>, vector<4x288xf32>
    tpu.vector_store %arg6[%c20_18, %c0_19], %16 {strides = array<i32>} : memref<36x288xf32, #tpu.memory_space<vmem>>, vector<4x288xf32>,
    %c0_20 = arith.constant 0 : index
    %c0_21 = arith.constant 0 : index
    %c36 = arith.constant 36 : index
    %18 = vector.load %arg2[%c0_20, %c0_21, %c36] : memref<1x4x342xf32, #tpu.memory_space<vmem>>, vector<1x4x288xf32>
    %19 = vector.shape_cast %18 : vector<1x4x288xf32> to vector<4x288xf32>
    %c24 = arith.constant 24 : index
    %c0_22 = arith.constant 0 : index
    %20 = vector.load %arg6[%c24, %c0_22] : memref<36x288xf32, #tpu.memory_space<vmem>>, vector<4x288xf32>
    tpu.vector_store %arg6[%c24, %c0_22], %19 {strides = array<i32>} : memref<36x288xf32, #tpu.memory_space<vmem>>, vector<4x288xf32>,
    %c0_23 = arith.constant 0 : index
    %c0_24 = arith.constant 0 : index
    %c37 = arith.constant 37 : index
    %21 = vector.load %arg2[%c0_23, %c0_24, %c37] : memref<1x4x342xf32, #tpu.memory_space<vmem>>, vector<1x4x288xf32>
    %22 = vector.shape_cast %21 : vector<1x4x288xf32> to vector<4x288xf32>
    %c28 = arith.constant 28 : index
    %c0_25 = arith.constant 0 : index
    %23 = vector.load %arg6[%c28, %c0_25] : memref<36x288xf32, #tpu.memory_space<vmem>>, vector<4x288xf32>
    tpu.vector_store %arg6[%c28, %c0_25], %22 {strides = array<i32>} : memref<36x288xf32, #tpu.memory_space<vmem>>, vector<4x288xf32>,
    %c0_26 = arith.constant 0 : index
    %c0_27 = arith.constant 0 : index
    %c38 = arith.constant 38 : index
    %24 = vector.load %arg2[%c0_26, %c0_27, %c38] : memref<1x4x342xf32, #tpu.memory_space<vmem>>, vector<1x4x288xf32>
    %25 = vector.shape_cast %24 : vector<1x4x288xf32> to vector<4x288xf32>
    %c32 = arith.constant 32 : index
    %c0_28 = arith.constant 0 : index
    %26 = vector.load %arg6[%c32, %c0_28] : memref<36x288xf32, #tpu.memory_space<vmem>>, vector<4x288xf32>
    tpu.vector_store %arg6[%c32, %c0_28], %25 {strides = array<i32>} : memref<36x288xf32, #tpu.memory_space<vmem>>, vector<4x288xf32>,
    %c0_29 = arith.constant 0 : index
    %c0_30 = arith.constant 0 : index
    %27 = vector.load %arg3[%c0_29, %c0_30] : memref<8x36xf32, #tpu.memory_space<vmem>>, vector<8x36xf32>
    %c0_31 = arith.constant 0 : index
    %c0_32 = arith.constant 0 : index
    %28 = vector.load %arg6[%c0_31, %c0_32] : memref<36x288xf32, #tpu.memory_space<vmem>>, vector<36x288xf32>
    %cst = arith.constant dense<0.000000e+00> : vector<8x288xf32>
    %29 = tpu.matmul %27, %28, %cst {dimension_numbers = #tpu.dot_dimension_numbers<[1], [0], [0], [1], [0, 0, 1, 1], [], []>} : vector<8x36xf32>, vector<36x288xf32>, vector<8x288xf32> -> vector<8x288xf32>
    %c0_33 = arith.constant 0 : index
    %c0_34 = arith.constant 0 : index
    %30 = vector.load %arg4[%c0_33, %c0_34] : memref<8x1xf32, #tpu.memory_space<vmem>>, vector<8x1xf32>
    %31 = vector.broadcast %30 : vector<8x1xf32> to vector<8x288xf32>
    %32 = arith.addf %29, %31 : vector<8x288xf32>
    %c0_35 = arith.constant 0 : index
    %c0_36 = arith.constant 0 : index
    %c0_37 = arith.constant 0 : index
    %33 = vector.load %arg5[%c0_35, %c0_36, %c0_37] : memref<1x8x288xf32, #tpu.memory_space<vmem>>, vector<1x8x288xf32>
    %34 = vector.shape_cast %33 : vector<1x8x288xf32> to vector<8x288xf32>
    %35 = vector.shape_cast %32 : vector<8x288xf32> to vector<1x8x288xf32>
    tpu.vector_store %arg5[%c0_35, %c0_36, %c0_37], %35 {strides = array<i32>} : memref<1x8x288xf32, #tpu.memory_space<vmem>>, vector<1x8x288xf32>,
    return
  }
  func.func @transform_0(%arg0: i32, %arg1: i32) -> (i32, i32, i32) {
    %c0_i32 = arith.constant 0 : i32
    %c0_i32_0 = arith.constant 0 : i32
    %c0_i32_1 = arith.constant 0 : i32
    return %arg0, %c0_i32, %c0_i32_0 : i32, i32, i32
  }
  func.func @transform_1(%arg0: i32, %arg1: i32) -> (i32, i32) {
    %c0_i32 = arith.constant 0 : i32
    %c0_i32_0 = arith.constant 0 : i32
    %c0_i32_1 = arith.constant 0 : i32
    return %c0_i32, %c0_i32_0 : i32, i32
  }
  func.func @transform_2(%arg0: i32, %arg1: i32) -> (i32, i32) {
    %c0_i32 = arith.constant 0 : i32
    %c0_i32_0 = arith.constant 0 : i32
    %c0_i32_1 = arith.constant 0 : i32
    return %c0_i32, %c0_i32_0 : i32, i32
  }
  func.func @transform_3(%arg0: i32, %arg1: i32) -> (i32, i32, i32) {
    %c0_i32 = arith.constant 0 : i32
    %c0_i32_0 = arith.constant 0 : i32
    return %arg0, %c0_i32, %arg1 : i32, i32, i32
  }
}

</mosaic_0001>

<bundles_post_ra>
// kernel: conv_layer_forward.1
= control target key start
LH: loop header
LB: loop body
LE: loop exit
PB: predicated region body
PF: predicated region fallthrough
CT: control target
= control target key end

     0   :  { %s701_s12 = smov 0   ;;  %s703_s13 = smov 0   ;;  %s811_s0 = inlined_call_operand.vmem [shape: f32[2,4,342], index: 0, kind: input, shape index: {}]   ;;  %s812_s1 = inlined_call_operand.vmem [shape: f32[8,36], index: 1, kind: input, shape index: {}]   ;;  %s813_s2 = inlined_call_operand.vmem [shape: f32[8,1], index: 2, kind: input, shape index: {}]   ;;  %s814_s3 = inlined_call_operand.vmem [shape: f32[2,8,288], index: 3, kind: output, shape index: {}]  }
   0x1   :  { %s705_s14 = smov 0  }
   0x2 LB: > { %s25_s15 = sadd.s32 1, %s666_s13  ;;  %p601_p0 = scmp.ge.s32.totalorder %s670_s14, 1  ;;  %s670_s14 = sphi %s705_s14, %s13_s14   ;;  %s666_s13 = sphi %s703_s13, %s816_s13   ;;  %s662_s12 = sphi %s701_s12, %s815_s12  }
   0x3   : > { %p27_p1 = scmp.ge.s32.totalorder %s25_s15, 2  ;;  %p151_p2 = scmp.lt.s32.totalorder %s670_s14, 3 }
   0x5   : > { %s818_s15 = smov (%p27_p1, %s25_s15), 0  ;;  %p152_p3 = pnand %p601_p0, %p151_p2 }
   0x6   : > { %p179_p4 = scmp.lt.s32.totalorder (!%p152_p3), %s662_s12, 1  ;;  %s672_s20 = smov (!%p152_p3), 127  }
   0x7   : > { %155 = sbr.rel (%p152_p3) target bundleno = 370 (0x172), region = 32  ;;  %s673_s21 = smov (!%p152_p3), 126  }
   0x8   : > { %s674_s22 = smov (!%p152_p3), 110   ;;  %s675_s23 = smov (!%p152_p3), 109  }
   0x9   : > { %s676_s24 = smov (!%p152_p3), 108   ;;  %s677_s25 = smov (!%p152_p3), 92  }
   0xa   : > { %s678_s26 = smov (!%p152_p3), 91   ;;  %s679_s27 = smov (!%p152_p3), 90  }
   0xc   : > { %s820_s12 = smov (!%p179_p4, %s662_s12), 1  ;;  %vm209_vm0 = vcmask 257024   ;;  %vm236_vm1 = vcmask 261124   ;;  %vm331_vm2 = vcmask 883712   ;;  %vm305_vm3 = vcmask 891904  }
   0xd   : > { %s612_s16 = smul.u32 12, %s820_s12  ;;  %vm356_vm4 = vcmask 752640   ;;  %vm228_vm5 = vcmask 1039360   ;;  %vm382_vm6 = vcmask 744448   ;;  %vm254_vm7 = vcmask 1031168  }
   0xe   : > { %vm407_vm8 = vcmask 736256   ;;  %vm442_vm9 = vcmask 1043456   ;;  %vm280_vm10 = vcmask 900096   ;;  %vm438_vm11 = vcmask 293888   ;;  %s613_s5 = smul.u32 24, %s820_s12 }
   0xf   : > { %s725_s19 = scalar_lea.vmem %s811_s0, %s612_s16  ;;  %vm514_vm12 = vcmask 261120  }
  0x10   : > { %v195_v0 = vld [vmem:[%s725_s19 + $0x8] sm:$0xf]  ;;  %v729_v1 = vld [vmem:[%s725_s19] sm:$0xff]  ;;  %s192_s8 = scalar_lea.vmem %s814_s3, %s613_s5 }
  0x11   : > { %200 = vst [vmem:[#allocation1 + $0x10] ss:$2 sm:$0xff] %v195_v0  ;;  %v212_v2 = vld [vmem:[%s725_s19 + $0x8] sm:$0xf] }
  0x12   : > { %198 = vst [vmem:[#allocation1] ss:$2 sm:$0xff] %v729_v1  ;;  %v239_v6 = vld [vmem:[%s725_s19 + $0x8] sm:$0xf] }
  0x13   : > { %v264_v10 = vld [vmem:[%s725_s19 + $0x8] sm:$0xf] }
  0x14   : > { %v290_v14 = vld [vmem:[%s725_s19 + $0x8] sm:$0xf] }
  0x15   : > { %v315_v18 = vld [vmem:[%s725_s19 + $0x8] sm:$0xf] }
  0x16   : > { %v341_v22 = vld [vmem:[%s725_s19 + $0x8] sm:$0xf] }
  0x17   : > { %v366_v26 = vld [vmem:[%s725_s19 + $0x8] sm:$0xf] }
  0x18   : > { %v733_v3 = vld.sshfl [vmem:[#allocation1 + $0x10] sm:$0xff pattern:$0x75316420]  ;;  %v392_v30 = vld [vmem:[%s725_s19 + $0x8] sm:$0xf] }
  0x19   : > { %218 = vst [vmem:[#allocation1 + $0x11] ss:$2 sm:$0xff] %v212_v2  ;;  %v201_v4 = vld.sshfl [vmem:[#allocation1] sm:$0xff pattern:$0x75316420] }
  0x1a   : > { %v202_v5 = vld.sshfl [vmem:[#allocation1 + $0x8] sm:$0xff pattern:$0x75316420]  ;;  %207 = vst [vmem:[#allocation2] sm:$0xf] %v201_v4  ;;  %v432_v4 = vld [vmem:[%s813_s2] sm:$0xff] }
  0x1b   : > { %216 = vst [vmem:[#allocation1 + $0x1] ss:$2 sm:$0xff] %v729_v1 }
  0x1c   : > { %208 = vst [vmem:[#allocation2 + $0x8] sm:$0xf] %v202_v5  ;;  %v680_v5 = vmov 0  }
  0x1d   : > { %210 = vst.msk [vmem:[#allocation2 + $0x10] sm:$0xf] %vm209_vm0, %v733_v3  ;;  %647 = vset.pattern.permute.xlu0 %v680_v5 }
  0x20   : > { %v221_v7 = vld.sshfl [vmem:[#allocation1 + $0x10] sm:$0xff pattern:$0x75316420] }
  0x21   : > { %226 = vrot.lane.b32.xlu1 %v221_v7, %s672_s20  ;;  %244 = vst [vmem:[#allocation1 + $0x10] ss:$2 sm:$0xff] %v239_v6 }
  0x22   : > { %v738_v8 = vld.sshfl [vmem:[#allocation1] sm:$0xff pattern:$0x75316420]  ;;  %v740_v9 = vld.sshfl [vmem:[#allocation1 + $0x8] sm:$0xff pattern:$0x75316420] }
  0x23   : > { %242 = vst [vmem:[#allocation1] ss:$2 sm:$0xff] %v729_v1 }
  0x28   : > { %v247_v11 = vld.sshfl [vmem:[#allocation1 + $0x10] sm:$0xff pattern:$0x75316420] }
  0x29   : > { %252 = vrot.lane.b32.xlu1 %v247_v11, %s673_s21  ;;  %270 = vst [vmem:[#allocation1 + $0x11] ss:$2 sm:$0xff] %v264_v10 }
  0x2a   : > { %v245_v12 = vld.sshfl [vmem:[#allocation1] sm:$0xff pattern:$0x75316420]  ;;  %v246_v13 = vld.sshfl [vmem:[#allocation1 + $0x8] sm:$0xff pattern:$0x75316420] }
  0x2b   : > { %248 = vrot.lane.b32.xlu0 %v245_v12, %s673_s21  ;;  %268 = vst [vmem:[#allocation1 + $0x1] ss:$2 sm:$0xff] %v729_v1 }
  0x30   : > { %v273_v15 = vld.sshfl [vmem:[#allocation1 + $0x10] sm:$0xff pattern:$0x75316420] }
  0x31   : > { %278 = vrot.lane.b32.xlu2 %v273_v15, %s674_s22  ;;  %295 = vst [vmem:[#allocation1 + $0x10] ss:$2 sm:$0xff] %v290_v14 }
  0x32   : > { %v271_v16 = vld.sshfl [vmem:[#allocation1] sm:$0xff pattern:$0x75316420]  ;;  %v272_v17 = vld.sshfl [vmem:[#allocation1 + $0x8] sm:$0xff pattern:$0x75316420] }
  0x33   : > { %293 = vst [vmem:[#allocation1] ss:$2 sm:$0xff] %v729_v1 }
  0x38   : > { %v298_v19 = vld.sshfl [vmem:[#allocation1 + $0x10] sm:$0xff pattern:$0x75316420] }
  0x39   : > { %303 = vrot.lane.b32.xlu1 %v298_v19, %s675_s23  ;;  %321 = vst [vmem:[#allocation1 + $0x11] ss:$2 sm:$0xff] %v315_v18 }
  0x3a   : > { %v296_v20 = vld.sshfl [vmem:[#allocation1] sm:$0xff pattern:$0x75316420]  ;;  %v297_v21 = vld.sshfl [vmem:[#allocation1 + $0x8] sm:$0xff pattern:$0x75316420] }
  0x3b   : > { %299 = vrot.lane.b32.xlu2 %v296_v20, %s675_s23  ;;  %301 = vrot.lane.b32.xlu0 %v297_v21, %s675_s23  ;;  %319 = vst [vmem:[#allocation1 + $0x1] ss:$2 sm:$0xff] %v729_v1 }
  0x40   : > { %v324_v23 = vld.sshfl [vmem:[#allocation1 + $0x10] sm:$0xff pattern:$0x75316420] }
  0x41   : > { %346 = vst [vmem:[#allocation1 + $0x10] ss:$2 sm:$0xff] %v341_v22 }
  0x42   : > { %v322_v24 = vld.sshfl [vmem:[#allocation1] sm:$0xff pattern:$0x75316420]  ;;  %v323_v25 = vld.sshfl [vmem:[#allocation1 + $0x8] sm:$0xff pattern:$0x75316420] }
  0x43   : > { %329 = vrot.lane.b32.xlu2 %v324_v23, %s676_s24  ;;  %325 = vrot.lane.b32.xlu1 %v322_v24, %s676_s24  ;;  %344 = vst [vmem:[#allocation1] ss:$2 sm:$0xff] %v729_v1 }
  0x48   : > { %v349_v27 = vld.sshfl [vmem:[#allocation1 + $0x10] sm:$0xff pattern:$0x75316420] }
  0x49   : > { %372 = vst [vmem:[#allocation1 + $0x11] ss:$2 sm:$0xff] %v366_v26  ;;  %354 = vrot.lane.b32.xlu0 %v349_v27, %s677_s25 }
  0x4a   : > { %v348_v28 = vld.sshfl [vmem:[#allocation1 + $0x8] sm:$0xff pattern:$0x75316420]  ;;  %v347_v29 = vld.sshfl [vmem:[#allocation1] sm:$0xff pattern:$0x75316420] }
  0x4b   : > { %327 = vrot.lane.b32.xlu2 %v323_v25, %s676_s24  ;;  %352 = vrot.lane.b32.xlu1 %v348_v28, %s677_s25  ;;  %370 = vst [vmem:[#allocation1 + $0x1] ss:$2 sm:$0xff] %v729_v1 }
  0x50   : > { %v375_v31 = vld.sshfl [vmem:[#allocation1 + $0x10] sm:$0xff pattern:$0x75316420] }
  0x51   : > { %397 = vst [vmem:[#allocation1 + $0x10] ss:$2 sm:$0xff] %v392_v30  ;;  %350 = vrot.lane.b32.xlu0 %v347_v29, %s677_s25 }
  0x52   : > { %v374_v32 = vld.sshfl [vmem:[#allocation1 + $0x8] sm:$0xff pattern:$0x75316420]  ;;  %v373_v33 = vld.sshfl [vmem:[#allocation1] sm:$0xff pattern:$0x75316420] }
  0x53   : > { %274 = vrot.lane.b32.xlu2 %v271_v16, %s674_s22  ;;  %380 = vrot.lane.b32.xlu1 %v375_v31, %s678_s26  ;;  %395 = vst [vmem:[#allocation1] ss:$2 sm:$0xff] %v729_v1  ;;  %v416_v16 = vld [vmem:[%s812_s1] sm:$0xff] }
  0x58   : > { %v400_v34 = vld.sshfl [vmem:[#allocation1 + $0x10] sm:$0xff pattern:$0x75316420] }
  0x59   : > { %378 = vrot.lane.b32.xlu0 %v374_v32, %s678_s26 }
  0x5a   : > { %v398_v35 = vld.sshfl [vmem:[#allocation1] sm:$0xff pattern:$0x75316420]  ;;  %v399_v36 = vld.sshfl [vmem:[#allocation1 + $0x8] sm:$0xff pattern:$0x75316420] }
  0x5b   : > { %250 = vrot.lane.b32.xlu1 %v246_v13, %s673_s21  ;;  %376 = vrot.lane.b32.xlu2 %v373_v33, %s678_s26 }
  0x61   : > { %405 = vrot.lane.b32.xlu0 %v400_v34, %s679_s27 }
  0x63   : > { %401 = vrot.lane.b32.xlu2 %v398_v35, %s679_s27  ;;  %222 = vrot.lane.b32.xlu1 %v738_v8, %s672_s20 }
  0x69   : > { %403 = vrot.lane.b32.xlu0 %v399_v36, %s679_s27 }
  0x6b   : > { %224 = vrot.lane.b32.xlu2 %v740_v9, %s672_s20 }
  0x71   : > { %276 = vrot.lane.b32.xlu0 %v272_v17, %s674_s22 }
  0x79   : > { %435 = vperm.xlu0 %647, %v432_v4  }
  0x8b   : > { %v767_v37 = vpop.permute.xlu2 %278 }
  0x8c   : > { %288 = vst.msk [vmem:[#allocation2 + $0x28] sm:$0xf0] %vm236_vm1, %v767_v37 }
  0x93   : > { %v227_v38 = vpop.permute.xlu1 %226 }
  0x94   : > { %237 = vst.msk [vmem:[#allocation2 + $0x10] sm:$0xf0] %vm236_vm1, %v227_v38 }
  0x95   : > { %v300_v39 = vpop.permute.xlu2 %299 }
  0x9b   : > { %v253_v40 = vpop.permute.xlu1 %252  ;;  %v419_v18 = vld [vmem:[#allocation2 + $0x10] sm:$0xff] }
  0x9c   : > { %262 = vst.msk [vmem:[#allocation2 + $0x28] sm:$0xf] %vm209_vm0, %v253_v40 }
  0x9d   : > { %v330_v41 = vpop.permute.xlu2 %329  ;;  %v249_v42 = vpop.permute.xlu0 %248 }
  0x9e   : > { %339 = vst.msk [vmem:[#allocation2 + $0x40] sm:$0xf0] %vm236_vm1, %v330_v41 }
  0xa3   : > { %v422_v15 = vld [vmem:[#allocation2 + $0x28] sm:$0xff] }
  0xa5   : > { %v328_v43 = vpop.permute.xlu2 %327 }
  0xa6   : > { %v333_v44 = vsel %vm331_vm2, %v328_v43, %v330_v41 }
  0xa7   : > { %338 = vst [vmem:[#allocation2 + $0x38] sm:$0xf0] %v333_v44 }
  0xab   : > { %v304_v45 = vpop.permute.xlu1 %303 }
  0xac   : > { %313 = vst.msk [vmem:[#allocation2 + $0x40] sm:$0xf] %vm209_vm0, %v304_v45 }
  0xad   : > { %v776_v46 = vpop.permute.xlu2 %274  ;;  %v302_v47 = vpop.permute.xlu0 %301 }
  0xae   : > { %v306_v48 = vsel %vm305_vm3, %v300_v39, %v302_v47  ;;  %v307_v49 = vsel %vm305_vm3, %v302_v47, %v304_v45 }
  0xaf   : > { %311 = vst [vmem:[#allocation2 + $0x30] sm:$0xf] %v306_v48 }
  0xb0   : > { %312 = vst [vmem:[#allocation2 + $0x38] sm:$0xf] %v307_v49 }
  0xb3   : > { %v425_v14 = vld [vmem:[#allocation2 + $0x40] sm:$0xff] }
  0xb5   : > { %v326_v50 = vpop.permute.xlu1 %325  ;;  %v377_v51 = vpop.permute.xlu2 %376 }
  0xb6   : > { %v332_v52 = vsel %vm331_vm2, %v326_v50, %v328_v43 }
  0xb7   : > { %337 = vst [vmem:[#allocation2 + $0x30] sm:$0xf0] %v332_v52  ;;  %v424_v26 = vld [vmem:[#allocation2 + $0x38] sm:$0xff] }
  0xbb   : > { %v355_v53 = vpop.permute.xlu0 %354 }
  0xbc   : > { %364 = vst.msk [vmem:[#allocation2 + $0x58] sm:$0xf] %vm209_vm0, %v355_v53 }
  0xbd   : > { %v353_v54 = vpop.permute.xlu1 %352  ;;  %v402_v55 = vpop.permute.xlu2 %401 }
  0xbe   : > { %v358_v56 = vsel %vm356_vm4, %v353_v54, %v355_v53  ;;  %v423_v25 = vld [vmem:[#allocation2 + $0x30] sm:$0xff] }
  0xbf   : > { %363 = vst [vmem:[#allocation2 + $0x50] sm:$0xf] %v358_v56 }
  0xc3   : > { %v351_v57 = vpop.permute.xlu0 %350 }
  0xc4   : > { %v357_v58 = vsel %vm356_vm4, %v351_v57, %v353_v54 }
  0xc5   : > { %v381_v59 = vpop.permute.xlu1 %380  ;;  %362 = vst [vmem:[#allocation2 + $0x48] sm:$0xf] %v357_v58  ;;  %v225_v60 = vpop.permute.xlu2 %224 }
  0xc6   : > { %390 = vst.msk [vmem:[#allocation2 + $0x58] sm:$0xf0] %vm236_vm1, %v381_v59  ;;  %v230_v61 = vsel %vm228_vm5, %v225_v60, %v227_v38 }
  0xc7   : > { %235 = vst [vmem:[#allocation2 + $0x8] sm:$0xf0] %v230_v61 }
  0xcb   : > { %v379_v62 = vpop.permute.xlu0 %378 }
  0xcc   : > { %v383_v63 = vsel %vm382_vm6, %v377_v51, %v379_v62  ;;  %v384_v0 = vsel %vm382_vm6, %v379_v62, %v381_v59 }
  0xcd   : > { %v251_v1 = vpop.permute.xlu1 %250  ;;  %388 = vst [vmem:[#allocation2 + $0x48] sm:$0xf0] %v383_v63  ;;  %v428_v13 = vld [vmem:[#allocation2 + $0x58] sm:$0xff] }
  0xce   : > { %v255_v2 = vsel %vm254_vm7, %v249_v42, %v251_v1  ;;  %v256_v3 = vsel %vm254_vm7, %v251_v1, %v253_v40  ;;  %389 = vst [vmem:[#allocation2 + $0x50] sm:$0xf0] %v384_v0  ;;  %v418_v30 = vld [vmem:[#allocation2 + $0x8] sm:$0xff] }
  0xcf   : > { %260 = vst [vmem:[#allocation2 + $0x18] sm:$0xf] %v255_v2 }
  0xd0   : > { %261 = vst [vmem:[#allocation2 + $0x20] sm:$0xf] %v256_v3 }
  0xd3   : > { %v406_v6 = vpop.permute.xlu0 %405 }
  0xd4   : > { %415 = vst.msk [vmem:[#allocation2 + $0x70] sm:$0xf] %vm209_vm0, %v406_v6  ;;  %v426_v23 = vld [vmem:[#allocation2 + $0x48] sm:$0xff] }
  0xd5   : > { %v223_v7 = vpop.permute.xlu1 %222  ;;  %v427_v24 = vld [vmem:[#allocation2 + $0x50] sm:$0xff] }
  0xd6   : > { %v229_v8 = vsel %vm228_vm5, %v223_v7, %v225_v60 }
  0xd7   : > { %234 = vst [vmem:[#allocation2] sm:$0xf0] %v229_v8 }
  0xdb   : > { %v404_v9 = vpop.permute.xlu0 %403  ;;  %v431_v10 = vld [vmem:[#allocation2 + $0x70] sm:$0xf] }
  0xdc   : > { %v408_v11 = vsel %vm407_vm8, %v402_v55, %v404_v9  ;;  %v409_v12 = vsel %vm407_vm8, %v404_v9, %v406_v6  ;;  %608 = vmatpush.msk.msra.mxu2 %vm442_vm9, %v431_v10 }
  0xdd   : > { %413 = vst [vmem:[#allocation2 + $0x60] sm:$0xf] %v408_v11 }
  0xde   : > { %414 = vst [vmem:[#allocation2 + $0x68] sm:$0xf] %v409_v12  ;;  %504 = vmatpush.msra.mxu2 %v428_v13  ;;  %v417_v28 = vld [vmem:[#allocation2] sm:$0xff] }
  0xe0   : > { %505 = vmatpush.msra.mxu2 %v425_v14 }
  0xe2   : > { %506 = vmatpush.msra.mxu2 %v422_v15 }
  0xe3   : > { %v277_v17 = vpop.permute.xlu0 %276 }
  0xe4   : > { %v281_v19 = vsel %vm280_vm10, %v776_v46, %v277_v17  ;;  %v282_v20 = vsel %vm280_vm10, %v277_v17, %v767_v37  ;;  %507 = vmatpush.msra.mxu2 %v419_v18  ;;  %v429_v21 = vld [vmem:[#allocation2 + $0x60] sm:$0xf] }
  0xe5   : > { %286 = vst [vmem:[#allocation2 + $0x18] sm:$0xf0] %v281_v19  ;;  %604 = vmatpush.msk.msra.mxu0 %vm442_vm9, %v429_v21  ;;  %v430_v22 = vld [vmem:[#allocation2 + $0x68] sm:$0xf]  ;;  %609 = vmatmul.msk.f32.vlgmr.msra.gmra.mxu2 %vm438_vm11, %v416_v16 }
  0xe6   : > { %287 = vst [vmem:[#allocation2 + $0x20] sm:$0xf0] %v282_v20  ;;  %606 = vmatpush.msk.msra.mxu1 %vm442_vm9, %v430_v22 }
  0xe7   : > { %464 = vmatpush.msra.mxu0 %v426_v23 }
  0xe8   : > { %484 = vmatpush.msra.mxu1 %v427_v24 }
  0xe9   : > { %465 = vmatpush.msra.mxu0 %v423_v25 }
  0xea   : > { %485 = vmatpush.msra.mxu1 %v424_v26 }
  0xeb   : > { %v436_v31 = vpop.permute.xlu0 %435 }
  0xec   : > { %v420_v27 = vld [vmem:[#allocation2 + $0x18] sm:$0xff] }
  0xed   : > { %466 = vmatpush.msra.mxu0 %v420_v27  ;;  %v421_v29 = vld [vmem:[#allocation2 + $0x20] sm:$0xff] }
  0xee   : > { %486 = vmatpush.msra.mxu1 %v421_v29 }
  0xef   : > { %467 = vmatpush.msra.mxu0 %v417_v28 }
  0xf0   : > { %487 = vmatpush.msra.mxu1 %v418_v30  ;;  %605 = vmatmul.msk.f32.vlgmr.msra.gmra.mxu0 %vm438_vm11, %v416_v16 }
  0xf1   : > { %607 = vmatmul.msk.f32.vlgmr.msra.gmra.mxu1 %vm438_vm11, %v416_v16 }
 0x168   : > { %v509_v32 = vpop.f32.mrf.mxu2 }
 0x169   : > { %v510_v33 = vadd.f32 %v509_v32, %v436_v31 }
 0x16b   : > { %515 = vst.msk [vmem:[%s192_s8 + $0x10] sm:$0xff] %vm514_vm12, %v510_v33 }
 0x16d   : > { %v469_v34 = vpop.f32.mrf.mxu0 }
 0x16e   : > { %v470_v35 = vadd.f32 %v469_v34, %v436_v31  ;;  %v489_v36 = vpop.f32.mrf.mxu1 }
 0x16f   : > { %v490_v37 = vadd.f32 %v489_v36, %v436_v31 }
 0x170   : > { %512 = vst [vmem:[%s192_s8] sm:$0xff] %v470_v35 }
 0x171   : > { %513 = vst [vmem:[%s192_s8 + $0x8] sm:$0xff] %v490_v37 }
 0x172 PF: > { %s13_s14 = sadd.s32 1, %s670_s14   ;;  %s815_s12 = smov %s666_s13 }
 0x173   : > { %p10_p5 = scmp.ge.s32.totalorder %s13_s14, 4   ;;  %s816_s13 = smov %s818_s15 }
 0x175   :  { %12 = sbr.rel (!%p10_p5) target bundleno = 2 (0x2), region = 75 }

</bundles_post_ra>
